<compile_context>
chip_gen: v7x
topology: tpu7x:2x2x1
jax: 0.10.0
libtpu: 0.0.40
codegen_flags: <defaults>
</compile_context>

<pallas_src>
import functools

import jax
import jax.numpy as jnp
from jax.experimental import pallas as pl
from jax.experimental.pallas import tpu as pltpu


def _activation_unit_kernel(hist_ref, targ_ref, w1t_ref, w1hp_ref, bias_ref,
                            w2_ref, alpha_ref, omalpha_ref, b2_ref, out_ref,
                            *, use_softmax):
    hist = hist_ref[...].astype(jnp.float32)                 # (TB, S, D)
    targ = targ_ref[...]                                      # (TB, D)
    tb, seq, d = hist.shape
    hidden = w1hp_ref.shape[1]

    # Target branch hoisted: one small (TB, H) matmul per block; BN(eval)/b1 folded in.
    t_part = jnp.dot(targ, w1t_ref[...],
                     preferred_element_type=jnp.float32) + bias_ref[...]      # (TB, H)

    # Merged K=2D contraction:  [hist, targ*hist] @ [w1_h ; w1_p]
    #   (cat([t,h,t-h,t*h]) @ W1 == t@(W1_0+W1_2) + h@(W1_1-W1_2) + (t*h)@W1_3,
    #    folded in the wrapper; the last two blocks are concatenated into w1_hp.)
    prod = hist * targ[:, None, :]                            # implicit sublane broadcast
    lhs = jnp.concatenate([hist, prod], axis=-1).reshape(tb * seq, 2 * d)
    h = jnp.dot(lhs, w1hp_ref[...], preferred_element_type=jnp.float32)       # (TB*S, H)
    h = h.reshape(tb, seq, hidden) + t_part[:, None, :]       # implicit broadcast over seq

    # Dice activation (torch_rechub semantics).  Per-element eps hoisted out of the sum:
    #   sum((x-avg)^2 + eps) == sum((x-avg)^2) + H*eps.
    avg = jnp.mean(h, axis=-1, keepdims=True)                                 # (TB, S, 1)
    var = jnp.sum((h - avg) ** 2, axis=-1, keepdims=True) + hidden * 1e-3     # (TB, S, 1)
    ps = jax.nn.sigmoid((h - avg) * jax.lax.rsqrt(var))
    # ps*h + (1-ps)*alpha*h == h * (alpha + ps*(1-alpha));  alpha may be per-channel (1, H).
    h = h * (alpha_ref[...] + ps * omalpha_ref[...])

    # Final Linear(H, 1): VPU multiply + lane reduction (avoids a 1-column MXU matmul).
    att = jnp.sum(h * w2_ref[...], axis=-1, keepdims=True) + b2_ref[0]        # (TB, S, 1)
    if use_softmax:
        att = jax.nn.softmax(att, axis=1)

    # Weighted sum over the sequence axis (sublane reduce).
    out_ref[...] = jnp.sum(att * hist, axis=1)                                # (TB, D)


def _pick_batch_tile(batch, seq, emb_dim, itemsize=4,
                     target_tile_bytes=4 << 20, max_rows=8192):
    """Choose (TB, padded_batch).

    TB is sized by bytes (~target_tile_bytes of history per grid step, so the per-step
    DMA dwarfs the ~0.35 us grid-step overhead) and capped by rows so the lane-padded
    f32 temporaries of the Dice phase (~3-4 KiB/row) plus the double-buffered history
    tile stay under v7x's 64 MiB-per-TensorCore VMEM.  TB is a multiple of 8 (sublane
    constraint on the (TB, D) blocks) unless one tile covers the whole batch; the batch
    is padded up to a multiple of TB, which also guarantees >= 2 grid steps whenever
    TB < batch so dimension_semantics=("parallel",) can feed both TensorCores.
    """
    hist_bytes_per_elem = seq * emb_dim * itemsize
    tb = max(1, min(target_tile_bytes // hist_bytes_per_elem,
                    max_rows // seq,
                    batch))
    if tb >= batch:
        return batch, batch                  # whole batch fits in one comfortable tile
    tb = max(8, (tb // 8) * 8)               # sublane-align the batch tile
    if tb >= batch:
        return batch, batch
    # TODO(synk): for extremely long sequences (seq*8 rows >> max_rows) the sequence
    # axis itself would need tiling / an inner fori_loop chunking of the Dice phase.
    padded = pl.cdiv(batch, tb) * tb
    return tb, padded


def activation_unit(history, target, params, use_softmax=False,
                    history_dtype=jnp.float32):
    """history: (B, S, D), target: (B, D) -> (B, D) f32."""
    B, S, D = history.shape
    H = params["w1"].shape[1]

    # --- One-time parameter folding (outside the kernel) -------------------------
    # BatchNorm1d eval:  BN(x@W1 + b1) = x@(W1*scale) + ((b1 - rmean)*scale + beta)
    scale = params["gamma"].reshape(1, H) * jax.lax.rsqrt(
        params["rvar"].reshape(1, H) + 1e-5)
    w1s = params["w1"].astype(jnp.float32) * scale                            # (4D, H)
    bias = ((params["b1"].reshape(1, H) - params["rmean"].reshape(1, H)) * scale
            + params["beta"].reshape(1, H)).astype(jnp.float32)               # (1, H)

    # Merge the (t - h) weight block into the t and h blocks, then concatenate the
    # history and target*history blocks into one K=2D contraction.
    w1_t = (w1s[0:D] + w1s[2 * D:3 * D]).astype(jnp.float32)        # (D, H)   target
    w1_h = w1s[D:2 * D] - w1s[2 * D:3 * D]                          # (D, H)   history
    w1_p = w1s[3 * D:4 * D]                                         # (D, H)   target*history
    w1_hp = jnp.concatenate([w1_h, w1_p], axis=0).astype(jnp.float32)   # (2D, H)

    w2_row = params["w2"].astype(jnp.float32).reshape(1, H)                   # (1, H)
    # Dice alpha may be a scalar or per-hidden-unit; broadcast to a (1, H) row.
    alpha_row = jnp.broadcast_to(
        params["alpha"].astype(jnp.float32).reshape(1, -1), (1, H))
    omalpha_row = (1.0 - alpha_row).astype(jnp.float32)
    b2 = params["b2"].astype(jnp.float32).reshape(-1)[:1]                     # (1,) scalar

    # --- Batch tiling: bytes-sized tile, batch padded to a multiple of TB --------
    TB, B_pad = _pick_batch_tile(B, S, D, jnp.dtype(history_dtype).itemsize)
    hist_in = history.astype(history_dtype)
    targ_in = target.astype(jnp.float32)
    if B_pad != B:
        hist_in = jnp.pad(hist_in, ((0, B_pad - B), (0, 0), (0, 0)))
        targ_in = jnp.pad(targ_in, ((0, B_pad - B), (0, 0)))

    grid = (B_pad // TB,)
    const = lambda b: (0, 0)
    kernel = functools.partial(_activation_unit_kernel, use_softmax=use_softmax)

    grid_spec = pltpu.PrefetchScalarGridSpec(
        num_scalar_prefetch=0,
        grid=grid,
        in_specs=[
            pl.BlockSpec((TB, S, D), lambda b: (b, 0, 0)),        # history tile
            pl.BlockSpec((TB, D), lambda b: (b, 0)),              # target tile (un-broadcast)
            pl.BlockSpec((D, H), const),                          # w1_t   (resident)
            pl.BlockSpec((2 * D, H), const),                      # w1_hp  (resident)
            pl.BlockSpec((1, H), const),                          # folded bias
            pl.BlockSpec((1, H), const),                          # w2 as a row
            pl.BlockSpec((1, H), const),                          # dice alpha row
            pl.BlockSpec((1, H), const),                          # (1 - alpha) row
            pl.BlockSpec(memory_space=pltpu.MemorySpace.SMEM),    # b2 scalar
        ],
        out_specs=pl.BlockSpec((TB, D), lambda b: (b, 0)),
    )

    out = pl.pallas_call(
        kernel,
        out_shape=jax.ShapeDtypeStruct((B_pad, D), jnp.float32),
        grid_spec=grid_spec,
        compiler_params=pltpu.CompilerParams(
            dimension_semantics=("parallel",),    # shards batch-tile grid across TCs
            vmem_limit_bytes=48 << 20),           # > default scoped limit, < v7x 64 MiB/TC
    )(hist_in, targ_in, w1_t, w1_hp, bias, w2_row, alpha_row, omalpha_row, b2)

    return out[:B] if B_pad != B else out


def activation_unit_reference(history, target, params, use_softmax=False):
    """Pure-JAX reference mirroring the PyTorch module (eval mode)."""
    B, S, D = history.shape
    t = jnp.broadcast_to(target[:, None, :], (B, S, D))
    x = jnp.concatenate([t, history, t - history, t * history], axis=-1).reshape(-1, 4 * D)
    h = x @ params["w1"] + params["b1"]
    h = (h - params["rmean"]) / jnp.sqrt(params["rvar"] + 1e-5) * params["gamma"] + params["beta"]
    avg = h.mean(axis=1, keepdims=True)
    var = ((h - avg) ** 2 + 1e-3).sum(axis=1, keepdims=True)
    ps = jax.nn.sigmoid((h - avg) / jnp.sqrt(var))
    alpha = params["alpha"].reshape(1, -1)
    h = ps * h + (1.0 - ps) * alpha * h
    att = (h @ params["w2"] + params["b2"]).reshape(B, S)
    if use_softmax:
        att = jax.nn.softmax(att, axis=-1)
    return (att[:, :, None] * history).sum(axis=1)


if __name__ == "__main__":
    B, S, D, H = 2, 8, 32, 36   # batch, seq_length, emb_dim, attention hidden dim

    key = jax.random.PRNGKey(0)
    k_hist, k_targ, k_w1, k_b1, k_w2, k_b2, k_alpha = jax.random.split(key, 7)

    history = jax.random.normal(k_hist, (B, S, D), dtype=jnp.float32)
    target = jax.random.normal(k_targ, (B, D), dtype=jnp.float32)

    # Parameters follow MLP(4*D, dims=[36], activation='dice') + Linear(36, 1).
    # TODO(synk): BatchNorm1d / Dropout are implemented in eval mode (running stats,
    # no dropout); training-mode batch statistics are not reproduced.
    params = {
        "w1": jax.random.normal(k_w1, (4 * D, H), dtype=jnp.float32) * 0.05,
        "b1": jax.random.normal(k_b1, (1, H), dtype=jnp.float32) * 0.01,
        "gamma": jnp.ones((1, H), dtype=jnp.float32),
        "beta": jnp.zeros((1, H), dtype=jnp.float32),
        "rmean": jnp.zeros((1, H), dtype=jnp.float32),
        "rvar": jnp.ones((1, H), dtype=jnp.float32),
        "alpha": jax.random.normal(k_alpha, (1,), dtype=jnp.float32),   # Dice alpha (scalar)
        "w2": jax.random.normal(k_w2, (H, 1), dtype=jnp.float32) * 0.1,
        "b2": jax.random.normal(k_b2, (1, 1), dtype=jnp.float32) * 0.01,
    }

    out = activation_unit(history, target, params, use_softmax=False)
    out = jax.block_until_ready(out)

    ref = activation_unit_reference(history, target, params, use_softmax=False)
    assert out.shape == (B, D) and out.dtype == jnp.float32
    assert jnp.allclose(out, ref, atol=1e-4, rtol=1e-4), "mismatch vs reference"

    print("KERNEL_OK")
</pallas_src>

<mosaic_0001>
module attributes {stable_mosaic.version = 11 : i64} {
  func.func @_activation_unit_kernel(%arg0: i32, %arg1: memref<2x8x32xf32, #tpu.memory_space<vmem>>, %arg2: memref<2x32xf32, #tpu.memory_space<vmem>>, %arg3: memref<32x36xf32, #tpu.memory_space<vmem>>, %arg4: memref<64x36xf32, #tpu.memory_space<vmem>>, %arg5: memref<1x36xf32, #tpu.memory_space<vmem>>, %arg6: memref<1x36xf32, #tpu.memory_space<vmem>>, %arg7: memref<1x36xf32, #tpu.memory_space<vmem>>, %arg8: memref<1x36xf32, #tpu.memory_space<vmem>>, %arg9: memref<1xf32, #tpu.memory_space<smem>>, %arg10: memref<2x32xf32, #tpu.memory_space<vmem>>) attributes {dimension_semantics = [#tpu.dimension_semantics<parallel>], iteration_bounds = array<i64: 1>, scalar_prefetch = 0 : i64, scratch_operands = 0 : i64, tpu.core_type = #tpu.core_type<tc>, window_params = [{transform_indices = @transform_0, window_bounds = array<i64: 2, 8, 32>}, {transform_indices = @transform_1, window_bounds = array<i64: 2, 32>}, {pipeline_mode = #tpu.pipeline_mode<synchronous>, transform_indices = @transform_2, window_bounds = array<i64: 32, 36>}, {pipeline_mode = #tpu.pipeline_mode<synchronous>, transform_indices = @transform_3, window_bounds = array<i64: 64, 36>}, {pipeline_mode = #tpu.pipeline_mode<synchronous>, transform_indices = @transform_4, window_bounds = array<i64: 1, 36>}, {pipeline_mode = #tpu.pipeline_mode<synchronous>, transform_indices = @transform_5, window_bounds = array<i64: 1, 36>}, {pipeline_mode = #tpu.pipeline_mode<synchronous>, transform_indices = @transform_6, window_bounds = array<i64: 1, 36>}, {pipeline_mode = #tpu.pipeline_mode<synchronous>, transform_indices = @transform_7, window_bounds = array<i64: 1, 36>}, {transform_indices = @transform_8, window_bounds = array<i64: 1>}, {transform_indices = @transform_9, window_bounds = array<i64: 2, 32>}]} {
    %c0 = arith.constant 0 : index
    %c0_0 = arith.constant 0 : index
    %c0_1 = arith.constant 0 : index
    %0 = vector.load %arg1[%c0, %c0_0, %c0_1] : memref<2x8x32xf32, #tpu.memory_space<vmem>>, vector<2x8x32xf32>
    %c0_2 = arith.constant 0 : index
    %c0_3 = arith.constant 0 : index
    %1 = vector.load %arg2[%c0_2, %c0_3] : memref<2x32xf32, #tpu.memory_space<vmem>>, vector<2x32xf32>
    %c0_4 = arith.constant 0 : index
    %c0_5 = arith.constant 0 : index
    %2 = vector.load %arg3[%c0_4, %c0_5] : memref<32x36xf32, #tpu.memory_space<vmem>>, vector<32x36xf32>
    %cst = arith.constant dense<0.000000e+00> : vector<2x36xf32>
    %3 = tpu.matmul %1, %2, %cst {dimension_numbers = #tpu.dot_dimension_numbers<[1], [0], [0], [1], [0, 0, 1, 1], [], []>} : vector<2x32xf32>, vector<32x36xf32>, vector<2x36xf32> -> vector<2x36xf32>
    %c0_6 = arith.constant 0 : index
    %c0_7 = arith.constant 0 : index
    %4 = vector.load %arg5[%c0_6, %c0_7] : memref<1x36xf32, #tpu.memory_space<vmem>>, vector<1x36xf32>
    %5 = vector.broadcast %4 : vector<1x36xf32> to vector<2x36xf32>
    %6 = arith.addf %3, %5 : vector<2x36xf32>
    %7 = vector.shape_cast %1 : vector<2x32xf32> to vector<2x1x32xf32>
    %8 = vector.broadcast %7 : vector<2x1x32xf32> to vector<2x8x32xf32>
    %9 = arith.mulf %0, %8 : vector<2x8x32xf32>
    %10 = tpu.concatenate %0, %9 in 2 : vector<2x8x32xf32>, vector<2x8x32xf32> -> vector<2x8x64xf32>
    %11 = vector.shape_cast %10 : vector<2x8x64xf32> to vector<16x64xf32>
    %c0_8 = arith.constant 0 : index
    %c0_9 = arith.constant 0 : index
    %12 = vector.load %arg4[%c0_8, %c0_9] : memref<64x36xf32, #tpu.memory_space<vmem>>, vector<64x36xf32>
    %cst_10 = arith.constant dense<0.000000e+00> : vector<16x36xf32>
    %13 = tpu.matmul %11, %12, %cst_10 {dimension_numbers = #tpu.dot_dimension_numbers<[1], [0], [0], [1], [0, 0, 1, 1], [], []>} : vector<16x64xf32>, vector<64x36xf32>, vector<16x36xf32> -> vector<16x36xf32>
    %14 = vector.shape_cast %13 : vector<16x36xf32> to vector<2x8x36xf32>
    %15 = vector.shape_cast %6 : vector<2x36xf32> to vector<2x1x36xf32>
    %16 = vector.broadcast %15 : vector<2x1x36xf32> to vector<2x8x36xf32>
    %17 = arith.addf %14, %16 : vector<2x8x36xf32>
    %cst_11 = arith.constant dense<0.000000e+00> : vector<2x8xf32>
    %18 = vector.multi_reduction <add>, %17, %cst_11 [2] : vector<2x8x36xf32> to vector<2x8xf32>
    %19 = vector.shape_cast %18 : vector<2x8xf32> to vector<2x8x1xf32>
    %cst_12 = arith.constant 3.600000e+01 : f32
    %20 = vector.broadcast %cst_12 : f32 to vector<2x8x1xf32>
    %21 = arith.divf %19, %20 : vector<2x8x1xf32>
    %22 = vector.broadcast %21 : vector<2x8x1xf32> to vector<2x8x36xf32>
    %23 = arith.subf %17, %22 : vector<2x8x36xf32>
    %24 = arith.mulf %23, %23 : vector<2x8x36xf32>
    %cst_13 = arith.constant dense<0.000000e+00> : vector<2x8xf32>
    %25 = vector.multi_reduction <add>, %24, %cst_13 [2] : vector<2x8x36xf32> to vector<2x8xf32>
    %26 = vector.shape_cast %25 : vector<2x8xf32> to vector<2x8x1xf32>
    %cst_14 = arith.constant 3.600000e-02 : f32
    %27 = vector.broadcast %cst_14 : f32 to vector<2x8x1xf32>
    %28 = arith.addf %26, %27 : vector<2x8x1xf32>
    %29 = vector.broadcast %21 : vector<2x8x1xf32> to vector<2x8x36xf32>
    %30 = arith.subf %17, %29 : vector<2x8x36xf32>
    %31 = math.rsqrt %28 : vector<2x8x1xf32>
    %32 = vector.broadcast %31 : vector<2x8x1xf32> to vector<2x8x36xf32>
    %33 = arith.mulf %30, %32 : vector<2x8x36xf32>
    %34 = arith.negf %33 : vector<2x8x36xf32>
    %35 = math.exp %34 : vector<2x8x36xf32>
    %cst_15 = arith.constant 1.000000e+00 : f32
    %36 = vector.broadcast %cst_15 : f32 to vector<2x8x36xf32>
    %37 = arith.addf %36, %35 : vector<2x8x36xf32>
    %38 = arith.divf %36, %37 : vector<2x8x36xf32>
    %c0_16 = arith.constant 0 : index
    %c0_17 = arith.constant 0 : index
    %39 = vector.load %arg7[%c0_16, %c0_17] : memref<1x36xf32, #tpu.memory_space<vmem>>, vector<1x36xf32>
    %c0_18 = arith.constant 0 : index
    %c0_19 = arith.constant 0 : index
    %40 = vector.load %arg8[%c0_18, %c0_19] : memref<1x36xf32, #tpu.memory_space<vmem>>, vector<1x36xf32>
    %41 = vector.shape_cast %40 : vector<1x36xf32> to vector<1x1x36xf32>
    %42 = vector.broadcast %41 : vector<1x1x36xf32> to vector<2x8x36xf32>
    %43 = arith.mulf %38, %42 : vector<2x8x36xf32>
    %44 = vector.shape_cast %39 : vector<1x36xf32> to vector<1x1x36xf32>
    %45 = vector.broadcast %44 : vector<1x1x36xf32> to vector<2x8x36xf32>
    %46 = arith.addf %45, %43 : vector<2x8x36xf32>
    %47 = arith.mulf %17, %46 : vector<2x8x36xf32>
    %c0_20 = arith.constant 0 : index
    %c0_21 = arith.constant 0 : index
    %48 = vector.load %arg6[%c0_20, %c0_21] : memref<1x36xf32, #tpu.memory_space<vmem>>, vector<1x36xf32>
    %49 = vector.shape_cast %48 : vector<1x36xf32> to vector<1x1x36xf32>
    %50 = vector.broadcast %49 : vector<1x1x36xf32> to vector<2x8x36xf32>
    %51 = arith.mulf %47, %50 : vector<2x8x36xf32>
    %cst_22 = arith.constant dense<0.000000e+00> : vector<2x8xf32>
    %52 = vector.multi_reduction <add>, %51, %cst_22 [2] : vector<2x8x36xf32> to vector<2x8xf32>
    %53 = vector.shape_cast %52 : vector<2x8xf32> to vector<2x8x1xf32>
    %c0_23 = arith.constant 0 : index
    %54 = memref.load %arg9[%c0_23] : memref<1xf32, #tpu.memory_space<smem>>
    %55 = vector.broadcast %54 : f32 to vector<2x8x1xf32>
    %56 = arith.addf %53, %55 : vector<2x8x1xf32>
    %57 = vector.broadcast %56 : vector<2x8x1xf32> to vector<2x8x32xf32>
    %58 = arith.mulf %57, %0 : vector<2x8x32xf32>
    %cst_24 = arith.constant dense<0.000000e+00> : vector<2x32xf32>
    %59 = vector.multi_reduction <add>, %58, %cst_24 [1] : vector<2x8x32xf32> to vector<2x32xf32>
    %c0_25 = arith.constant 0 : index
    %c0_26 = arith.constant 0 : index
    %60 = vector.load %arg10[%c0_25, %c0_26] : memref<2x32xf32, #tpu.memory_space<vmem>>, vector<2x32xf32>
    tpu.vector_store %arg10[%c0_25, %c0_26], %59 {strides = array<i32>} : memref<2x32xf32, #tpu.memory_space<vmem>>, vector<2x32xf32>,
    return
  }
  func.func @transform_0(%arg0: i32) -> (i32, i32, i32) {
    %c0_i32 = arith.constant 0 : i32
    %c0_i32_0 = arith.constant 0 : i32
    %c0_i32_1 = arith.constant 0 : i32
    return %arg0, %c0_i32, %c0_i32_0 : i32, i32, i32
  }
  func.func @transform_1(%arg0: i32) -> (i32, i32) {
    %c0_i32 = arith.constant 0 : i32
    %c0_i32_0 = arith.constant 0 : i32
    return %arg0, %c0_i32 : i32, i32
  }
  func.func @transform_2(%arg0: i32) -> (i32, i32) {
    %c0_i32 = arith.constant 0 : i32
    %c0_i32_0 = arith.constant 0 : i32
    %c0_i32_1 = arith.constant 0 : i32
    return %c0_i32, %c0_i32_0 : i32, i32
  }
  func.func @transform_3(%arg0: i32) -> (i32, i32) {
    %c0_i32 = arith.constant 0 : i32
    %c0_i32_0 = arith.constant 0 : i32
    %c0_i32_1 = arith.constant 0 : i32
    return %c0_i32, %c0_i32_0 : i32, i32
  }
  func.func @transform_4(%arg0: i32) -> (i32, i32) {
    %c0_i32 = arith.constant 0 : i32
    %c0_i32_0 = arith.constant 0 : i32
    %c0_i32_1 = arith.constant 0 : i32
    return %c0_i32, %c0_i32_0 : i32, i32
  }
  func.func @transform_5(%arg0: i32) -> (i32, i32) {
    %c0_i32 = arith.constant 0 : i32
    %c0_i32_0 = arith.constant 0 : i32
    %c0_i32_1 = arith.constant 0 : i32
    return %c0_i32, %c0_i32_0 : i32, i32
  }
  func.func @transform_6(%arg0: i32) -> (i32, i32) {
    %c0_i32 = arith.constant 0 : i32
    %c0_i32_0 = arith.constant 0 : i32
    %c0_i32_1 = arith.constant 0 : i32
    return %c0_i32, %c0_i32_0 : i32, i32
  }
  func.func @transform_7(%arg0: i32) -> (i32, i32) {
    %c0_i32 = arith.constant 0 : i32
    %c0_i32_0 = arith.constant 0 : i32
    %c0_i32_1 = arith.constant 0 : i32
    return %c0_i32, %c0_i32_0 : i32, i32
  }
  func.func @transform_8(%arg0: i32) -> i32 {
    %c0_i32 = arith.constant 0 : i32
    %c0_i32_0 = arith.constant 0 : i32
    return %c0_i32 : i32
  }
  func.func @transform_9(%arg0: i32) -> (i32, i32) {
    %c0_i32 = arith.constant 0 : i32
    %c0_i32_0 = arith.constant 0 : i32
    return %arg0, %c0_i32 : i32, i32
  }
}

</mosaic_0001>

<bundles_post_ra>
// kernel: tpu_custom_call.1
= control target key start
LH: loop header
LB: loop body
LE: loop exit
PB: predicated region body
PF: predicated region fallthrough
CT: control target
= control target key end

     0   :  { %v125_v0 = vlaneseq  ;;  %v523_v1 = vmov 1966171168   ;;  %v524_v6 = vmov 0.0|0.0   ;;  %vm525_vm0 = vmmov 0   ;;  %s672_s0 = inlined_call_operand.vmem [shape: f32[2,8,32], index: 0, kind: input, shape index: {}]   ;;  %s673_s1 = inlined_call_operand.vmem [shape: f32[2,32], index: 1, kind: input, shape index: {}]   ;;  %s674_s2 = inlined_call_operand.vmem [shape: f32[32,36], index: 2, kind: input, shape index: {}]   ;;  %s675_s3 = inlined_call_operand.vmem [shape: f32[64,36], index: 3, kind: input, shape index: {}]   ;;  %s676_s4 = inlined_call_operand.vmem [shape: f32[1,36], index: 4, kind: input, shape index: {}]   ;;  %s677_s5 = inlined_call_operand.vmem [shape: f32[1,36], index: 5, kind: input, shape index: {}]   ;;  %s678_s6 = inlined_call_operand.vmem [shape: f32[1,36], index: 6, kind: input, shape index: {}]   ;;  %s679_s7 = inlined_call_operand.vmem [shape: f32[1,36], index: 7, kind: input, shape index: {}]   ;;  %s680_s8 = inlined_call_operand.<no memory space> [shape: f32[1], index: 8, kind: input, shape index: {}]   ;;  %s681_s9 = inlined_call_operand.hbm [shape: f32[2,32], index: 9, kind: output, shape index: {}]  }
   0x1   :  { %v123_v2 = vunpack.c.l.s4 %v523_v1  ;;  %v37_v3 = vld [vmem:[%s674_s2] sm:$0xff]  ;;  %v38_v4 = vld [vmem:[%s674_s2 + $0x8] sm:$0xff]  ;;  %459 = vmatprep.subr.bf16.mxu0 %v524_v6  ;;  %v39_v10 = vld [vmem:[%s674_s2 + $0x10] sm:$0xff]  ;;  %v526_v11 = vmov 0.0  }
   0x2   :  { %v126_v5 = vshrl.u32 %v125_v0, 7  ;;  %v460_v7 = vpack.c.bf16 %v38_v4, %v37_v3  ;;  %v166_v8 = vld [vmem:[%s675_s3] sm:$0xff]  ;;  %v167_v9 = vld [vmem:[%s675_s3 + $0x8] sm:$0xff]  ;;  %437 = vmatprep.mubr.msk.f32.mxu0 %vm525_vm0, %v526_v11  ;;  %v40_v14 = vld [vmem:[%s674_s2 + $0x18] sm:$0xff] }
   0x3   :  { %v124_v12 = vunpack.c.0.s8 %v123_v2  ;;  %v465_v13 = vpack.c.bf16 %v167_v9, %v166_v8  ;;  %v168_v15 = vld [vmem:[%s675_s3 + $0x10] sm:$0xff]  ;;  %v169_v16 = vld [vmem:[%s675_s3 + $0x18] sm:$0xff]  ;;  %v36_v17 = vld [vmem:[%s673_s1] sm:$0x3]  ;;  %v463_v18 = vpack.c.bf16 %v40_v14, %v39_v10 }
   0x4   :  { %461 = vmatpush3.bf16.msra.mxu0 %v460_v7  ;;  %v469_v19 = vpack.c.bf16 %v169_v16, %v168_v15  ;;  %v170_v20 = vld [vmem:[%s675_s3 + $0x20] sm:$0xff]  ;;  %v171_v21 = vld [vmem:[%s675_s3 + $0x28] sm:$0xff] }
   0x5   :  { %v127_v22 = vsub.s32 %v124_v12, %v126_v5  ;;  %466 = vmatprep.subr.bf16.mxu1 %v465_v13  ;;  %462 = vmatprep.subr.bf16.mxu0 %v524_v6 }
   0x6   :  { %15 = vsyncpa [#allocation4], 0  ;;  %468 = vmatpush3.bf16.msra.mxu1 %v465_v13  ;;  %v146_v24 = vsub.s32 0, %v126_v5  ;;  %v473_v25 = vpack.c.bf16 %v171_v21, %v170_v20  ;;  %vm48_vm1 = vcmask 261120   ;;  %v172_v26 = vld [vmem:[%s675_s3 + $0x30] sm:$0xff]  ;;  %v173_v27 = vld [vmem:[%s675_s3 + $0x38] sm:$0xff] }
   0x7   :  { %v128_v23 = vrot.slane %v36_v17, %v127_v22  ;;  %470 = vmatprep.subr.bf16.mxu1 %v469_v19  ;;  %v621_v30 = vld [vmem:[%s672_s0] sm:$0xff]  ;;  %v477_v33 = vpack.c.bf16 %v173_v27, %v172_v26  ;;  %v627_v34 = vld [vmem:[%s672_s0 + $0x8] sm:$0xff]  ;;  %s527_s3 = smov 32   ;;  %vm174_vm2 = vcmask 523264   ;;  %vm291_vm3 = vcmask 293888  }
   0x8   :  { %464 = vmatpush3.bf16.msra.mxu0 %v463_v18  ;;  %v405_v44 = vld [vmem:[%s676_s4] ss:$0 sm:$0xff]  ;;  %vm386_vm4 = vcmask 1041409   ;;  %vm389_vm5 = vcmask 254976  }
   0x9   :  { %v129_v28 = vcombine.high %v128_v23, %v128_v23  ;;  %v136_v29 = vrot.slane %v128_v23, %v127_v22  ;;  %v411_v18 = vld [vmem:[%s679_s7] ss:$0 sm:$0xff] }
   0xa   :  { %472 = vmatpush3.bf16.msra.mxu1 %v469_v19  ;;  %v412_v20 = vld [vmem:[%s678_s6] ss:$0 sm:$0xff] }
   0xb   :  { %v147_v31 = vrot.slane %v136_v29, %v146_v24  ;;  %v143_v32 = vrot.slane %v129_v28, %v127_v22  ;;  %438 = vmatmul.mubr.msk.f32.vlgmr.msra.gmra.mrb[0].mxu0 %vm48_vm1, %v36_v17  ;;  %474 = vmatprep.subr.bf16.mxu1 %v473_v25 }
   0xd   :  { %v154_v35 = vmul.f32 %v147_v31, %v621_v30  ;;  %v151_v36 = vrot.slane %v143_v32, %v146_v24 }
   0xe   :  { %476 = vmatpush3.bf16.msra.mxu1 %v473_v25 }
   0xf   :  { %158 = vrot.lane.b32.xlu0 %v154_v35, %s527_s3  ;;  %v155_v37 = vmul.f32 %v151_v36, %v627_v34  ;;  %478 = vmatprep.subr.bf16.mxu1 %v477_v33  ;;  %v365_v35 = vstv %s680_s8 }
  0x12   :  { %480 = vmatpush3.bf16.msra.mxu1 %v477_v33 }
  0x13   :  { %160 = vrot.lane.b32.xlu0 %v155_v37, %s527_s3 }
  0x81   :  { %v159_v38 = vpop.permute.xlu0 %158 }
  0x82   :  { %v164_v39 = vsel %vm48_vm1, %v621_v30, %v159_v38 }
  0x83   :  { %456 = vmatprep.mubr.msk.f32.mxu1 %vm174_vm2, %v164_v39 }
  0x85   :  { %v161_v40 = vpop.permute.xlu0 %160 }
  0x86   :  { %v165_v41 = vsel %vm48_vm1, %v627_v34, %v161_v40 }
  0x87   :  { %457 = vmatmul.mubr.msk.f32.vlgmr.msra.gmra.mrb[0].mxu1 %vm174_vm2, %v165_v41 }
  0xde   :  { %v118_v42 = vpop.f32.mrb[0].mxu0 }
  0xdf   :  { %v439_v43 = vpop.f32.mrb[1].mxu0  ;;  %v119_v45 = vadd.f32 %v405_v44, %v118_v42 }
  0xe1   :  { %v263_v46 = vrot.slane %v119_v45, %v127_v22 }
  0xe3   :  { %v264_v47 = vcombine.high %v263_v46, %v263_v46  ;;  %v271_v49 = vrot.slane %v263_v46, %v127_v22 }
  0xe5   :  { %v278_v48 = vrot.slane %v264_v47, %v127_v22  ;;  %v282_v51 = vrot.slane %v271_v49, %v146_v24 }
  0xe7   :  { %v286_v50 = vrot.slane %v278_v48, %v146_v24  ;;  %v413_v24 = vld [vmem:[%s677_s5] ss:$0 sm:$0xff]  ;;  %s528_s5 = smov [#allocation3]  }
  0xe8   :  { %s397_s8 = sshll.u32 %s528_s5, 4  ;;  %s398_s8 = int_to_ptr.vmem [resolvable:$true] %s397_s8 }
  0xe9   :  { %s499_s22 = scalar_lea.vmem %s398_s8, 32  ;;  %p504_p1 = scmp.lt.s32.totalorder %s398_s8, %s398_s8 }
  0xea   :  { %p500_p0 = scmp.ne.s32.totalorder %s398_s8, %s499_s22  ;;  %p505_p2 = scmp.lt.s32.totalorder %s499_s22, %s499_s22 }
  0xec   :  { %p506_p3 = por %p505_p2, %p504_p1 }
  0xee   :  { %p507_p4 = pnand %p506_p3, %p500_p0 }
 0x15a   :  { %v458_v52 = vpop.f32.mrb[0].mxu1 }
 0x15b   :  { %v290_v53 = vadd.f32 %v458_v52, %v286_v50  ;;  %v247_v54 = vpop.f32.mrb[1].mxu1 }
 0x15c   :  { %v289_v55 = vadd.f32 %v282_v51, %v247_v54 }
 0x15d   :  { %v295_v57 = vsel %vm291_vm3, %v290_v53, 0.0 }
 0x15e   :  { %v292_v56 = vsel %vm291_vm3, %v289_v55, 0.0 }
 0x15f   :  { %293 = vadd.xlane.f32.xlu1 %v292_v56 }
 0x163   :  { %296 = vadd.xlane.f32.xlu1 %v295_v57 }
 0x1ec   :  { %v294_v58 = vpop.xlane.xlu1 %293 }
 0x1ed   :  { %v299_v59 = vmul.f32 0.027777778, %v294_v58 }
 0x1ef   :  { %v301_v60 = vsub.f32 %v289_v55, %v299_v59 }
 0x1f0   :  { %v297_v61 = vpop.xlane.xlu1 %296 }
 0x1f1   :  { %v300_v62 = vmul.f32 0.027777778, %v297_v61  ;;  %v303_v63 = vmul.f32 %v301_v60, %v301_v60 }
 0x1f3   :  { %v302_v0 = vsub.f32 %v290_v53, %v300_v62  ;;  %v305_v1 = vsel %vm291_vm3, %v303_v63, 0.0 }
 0x1f4   :  { %306 = vadd.xlane.f32.xlu0 %v305_v1 }
 0x1f5   :  { %v304_v2 = vmul.f32 %v302_v0, %v302_v0 }
 0x1f7   :  { %v308_v3 = vsel %vm291_vm3, %v304_v2, 0.0 }
 0x1f8   :  { %309 = vadd.xlane.f32.xlu1 %v308_v3 }
 0x281   :  { %v307_v4 = vpop.xlane.xlu0 %306 }
 0x282   :  { %v311_v5 = vadd.f32 0.036, %v307_v4 }
 0x284   :  { %487 = vrsqrt.f32 %v311_v5 }
 0x285   :  { %v310_v6 = vpop.xlane.xlu1 %309 }
 0x286   :  { %v312_v7 = vadd.f32 0.036, %v310_v6 }
 0x288   :  { %489 = vrsqrt.f32 %v312_v7 }
 0x28e   :  { %v488_v8 = vpop.eup %487 }
 0x28f   :  { %v315_v9 = vmul.f32 %v488_v8, %v301_v60 }
 0x291   :  { %v409_v10 = vmul.f32 -1.442695, %v315_v9 }
 0x292   :  { %v490_v11 = vpop.eup %489 }
 0x293   :  { %491 = vpow2.f32 %v409_v10  ;;  %v316_v12 = vmul.f32 %v490_v11, %v302_v0 }
 0x295   :  { %v410_v13 = vmul.f32 -1.442695, %v316_v12 }
 0x297   :  { %493 = vpow2.f32 %v410_v13 }
 0x29d   :  { %v492_v14 = vpop.eup %491 }
 0x29e   :  { %v323_v15 = vadd.f32 1.0, %v492_v14 }
 0x2a0   :  { %495 = vrcp.f32 %v323_v15 }
 0x2a1   :  { %v494_v16 = vpop.eup %493 }
 0x2a2   :  { %v324_v17 = vadd.f32 1.0, %v494_v16 }
 0x2a4   :  { %497 = vrcp.f32 %v324_v17 }
 0x2aa   :  { %v496_v19 = vpop.eup %495 }
 0x2ab   :  { %v337_v21 = vmul.f32 %v496_v19, %v411_v18 }
 0x2ad   :  { %v345_v22 = vadd.f32 %v412_v20, %v337_v21 }
 0x2ae   :  { %v498_v23 = vpop.eup %497 }
 0x2af   :  { %v347_v25 = vmul.f32 %v345_v22, %v289_v55  ;;  %v338_v26 = vmul.f32 %v498_v23, %v411_v18 }
 0x2b1   :  { %v356_v27 = vmul.f32 %v413_v24, %v347_v25  ;;  %v346_v28 = vadd.f32 %v412_v20, %v338_v26 }
 0x2b3   :  { %v358_v29 = vsel %vm291_vm3, %v356_v27, 0.0  ;;  %v348_v31 = vmul.f32 %v346_v28, %v290_v53 }
 0x2b4   :  { %359 = vadd.xlane.f32.xlu1 %v358_v29 }
 0x2b5   :  { %v357_v32 = vmul.f32 %v413_v24, %v348_v31 }
 0x2b7   :  { %v361_v33 = vsel %vm291_vm3, %v357_v32, 0.0 }
 0x2b8   :  { %362 = vadd.xlane.f32.xlu1 %v361_v33 }
 0x341   :  { %v360_v36 = vpop.xlane.xlu1 %359 }
 0x342   :  { %v366_v37 = vadd.f32 %v365_v35, %v360_v36 }
 0x344   :  { %v368_v38 = vmul.f32 %v366_v37, %v621_v30 }
 0x345   :  { %v363_v39 = vpop.xlane.xlu1 %362 }
 0x346   :  { %v370_v40 = vsel %vm48_vm1, %v368_v38, 0.0  ;;  %v367_v41 = vadd.f32 %v365_v35, %v363_v39 }
 0x347   :  { %v371_v42 = vrot.slane %v370_v40, 4 }
 0x348   :  { %v369_v43 = vmul.f32 %v367_v41, %v627_v34 }
 0x349   :  { %v372_v44 = vadd.f32 %v371_v42, %v370_v40 }
 0x34a   :  { %v377_v45 = vsel %vm48_vm1, %v369_v43, 0.0 }
 0x34b   :  { %v373_v46 = vrot.slane %v372_v44, 2  ;;  %v378_v47 = vrot.slane %v377_v45, 4 }
 0x34d   :  { %v374_v48 = vadd.f32 %v373_v46, %v372_v44  ;;  %v379_v49 = vadd.f32 %v378_v47, %v377_v45 }
 0x34f   :  { %v380_v50 = vrot.slane %v379_v49, 2  ;;  %v375_v52 = vrot.slane %v374_v48, 1 }
 0x351   :  { %v381_v51 = vadd.f32 %v380_v50, %v379_v49  ;;  %v376_v30 = vadd.f32 %v375_v52, %v374_v48 }
 0x353   :  { %v382_v53 = vrot.slane %v381_v51, 1 }
 0x355   :  { %v383_v54 = vadd.f32 %v382_v53, %v381_v51 }
 0x357   :  { %v387_v55 = vsel %vm386_vm4, %v383_v54, %v376_v30 }
 0x358   :  { %390 = vst.msk [vmem:[#allocation3] sm:$0x3] %vm389_vm5, %v387_v55 }
 0x359   :  { %510 = shalt.err (!%p507_p4)
}
 0x35a   :  { %s511_s25 = scalar_lea.hbm %s681_s9, 32 }
 0x35b   :  { %p512_p5 = scmp.ne.s32.totalorder %s681_s9, %s511_s25  ;;  %p515_p6 = scmp.lt.u32.totalorder %s511_s25, %s681_s9 }
 0x35d   :  { %p517_p7 = pnand %p515_p6, %p512_p5 }
 0x35f   :  { %520 = shalt.err (!%p517_p7)
}
 0x360   :  { %400 = dma.vmem_to_hbm [thread:$0]  %s398_s8, 32, %s681_s9, [#allocation4]  }
 0x361   :  { %521 = dma.done.wait [#allocation4], 32  }
 0x362   :  { %522 = vsyncadd [#allocation4], 4294967264 }
 0x363   :  { %404 = vsyncpa [#allocation4], 1 }

</bundles_post_ra>
